<compile_context>
chip_gen: v6e
topology: v6e:2x2x1
jax: 0.10.0
libtpu: 0.0.40
codegen_flags: <defaults>
</compile_context>

<pallas_src>
import jax
import jax.numpy as jnp
from jax import lax
from jax.experimental import pallas as pl
from jax.experimental.pallas import tpu as pltpu

NEG_SLOPE = 0.1
BN_EPS = 1e-5


def _leaky(x):
    return jnp.where(x > 0, x, NEG_SLOPE * x)


# ---------------------------------------------------------------------------
# Fused kernel:  conv1x1 + BN1 + LReLU  ->  conv3x3 + BN2 + LReLU  -> +residual
# Spatial layout: zero-bordered (H+2, W+1) slab flattened to Lp lanes.
# ---------------------------------------------------------------------------
def _make_kernel(Wp, Lp):
    def kernel(x_ref, w1_ref, b1_ref, w2_ref, b2_ref, border_ref, out_ref):
        x = x_ref[0]                                    # (Cin, Lp) f32, zero-bordered

        # ---- stage 1: 1x1 conv (BN1 folded into w1), bf16 MXU, f32 accum ----
        h = jnp.dot(w1_ref[...], x.astype(jnp.bfloat16),
                    preferred_element_type=jnp.float32)
        # Bias + LeakyReLU would pollute the zero border; one multiply by the
        # (1, Lp) border vector restores it (replaces the old 9 per-tap masks).
        h = _leaky(h + b1_ref[...]) * border_ref[...]   # (C0p, Lp) f32

        # ---- stage 2: 3x3 conv (pad=1) as ONE im2col matmul -----------------
        # Tap (di, dj) of the stencil == circular lane roll of the zero-bordered
        # map by (di-1)*Wp + (dj-1); pad rows/columns/tail supply the conv's
        # zero padding, so the taps need no masking at all.
        pieces = []
        for di in range(3):
            for dj in range(3):
                s = (di - 1) * Wp + (dj - 1)
                pieces.append(h if s == 0
                              else pltpu.roll(h, shift=(-s) % Lp, axis=1))
        im2col = jnp.concatenate(pieces, axis=0).astype(jnp.bfloat16)  # (9*C0p, Lp)
        # TODO(synk): at realistic tiles, accumulate per-tap dots into an f32
        # scratch instead of materializing im2col (caps live VMEM at ~1/9th).

        y = jnp.dot(w2_ref[...], im2col, preferred_element_type=jnp.float32)
        y = _leaky(y + b2_ref[...])                     # (C1, Lp) f32

        # ---- residual add (requires planes[1] == inplanes), f32 -------------
        out_ref[0] = (y + x).astype(out_ref.dtype)

    return kernel


# ---------------------------------------------------------------------------
# Wrapper: BN folding, bf16 weight prep, zero-border layout plumbing (all
# outside the kernel).
# ---------------------------------------------------------------------------
def basic_block_forward(x_nchw, params):
    (w1, g1, be1, m1, v1, w2, g2, be2, m2, v2) = params
    N, Cin, H, W = x_nchw.shape
    C0 = w1.shape[0]
    C1 = w2.shape[0]
    assert C1 == Cin, "residual add requires planes[1] == inplanes"

    # Zero-bordered spatial slab: image at rows 1..H / cols 0..W-1 of an
    # (H+2, W+1) grid, flattened and lane-padded to a multiple of 128.
    Hp, Wp = H + 2, W + 1
    Lp = ((Hp * Wp + 127) // 128) * 128
    C0p = ((C0 + 7) // 8) * 8          # hidden channels -> full sublane tile

    # Fold BatchNorm (eval mode) into scale/bias; fold the scale into weights.
    s1 = g1 / jnp.sqrt(v1 + BN_EPS)
    b1 = be1 - m1 * s1
    s2 = g2 / jnp.sqrt(v2 + BN_EPS)
    b2 = be2 - m2 * s2

    # Weights in bf16 (MXU operands); biases stay f32 (VPU path).
    w1m = s1[:, None] * w1[:, :, 0, 0]                                    # (C0, Cin)
    w1p = jnp.zeros((C0p, Cin), jnp.float32).at[:C0].set(w1m).astype(jnp.bfloat16)
    b1p = jnp.zeros((C0p, 1), jnp.float32).at[:C0, 0].set(b1)

    # (C1, C0, 3, 3) -> (C1, 3, 3, C0) * s2 -> pad C0 -> (C1, 9*C0p) bf16.
    # Column order (di-major, dj, then C0p) matches the im2col piece order.
    w2m = jnp.transpose(w2, (0, 2, 3, 1)) * s2[:, None, None, None]
    w2p = jnp.zeros((C1, 3, 3, C0p), jnp.float32).at[:, :, :, :C0].set(w2m)
    w2p = w2p.reshape(C1, 9 * C0p).astype(jnp.bfloat16)
    b2p = b2.reshape(C1, 1).astype(jnp.float32)

    # Interior-pixel indicator over the padded slab (tiny: (1, Lp) f32).
    pos = jnp.arange(Lp, dtype=jnp.int32)
    row, col = pos // Wp, pos % Wp
    border = (((row >= 1) & (row <= H) & (col < W) & (pos < Hp * Wp))
              .astype(jnp.float32).reshape(1, Lp))

    # NCHW -> zero-bordered (N, Cin, Lp) slab (layout plumbing, outside kernel).
    xp = jnp.pad(x_nchw.astype(jnp.float32),
                 ((0, 0), (0, 0), (1, Hp - H - 1), (0, Wp - W)))
    xp = xp.reshape(N, Cin, Hp * Wp)
    xp = jnp.pad(xp, ((0, 0), (0, 0), (0, Lp - Hp * Wp)))

    out = pl.pallas_call(
        _make_kernel(Wp, Lp),
        out_shape=jax.ShapeDtypeStruct((N, C1, Lp), jnp.float32),
        grid=(N,),
        in_specs=[
            pl.BlockSpec((1, Cin, Lp), lambda n: (n, 0, 0)),
            pl.BlockSpec((C0p, Cin), lambda n: (0, 0)),
            pl.BlockSpec((C0p, 1), lambda n: (0, 0)),
            pl.BlockSpec((C1, 9 * C0p), lambda n: (0, 0)),
            pl.BlockSpec((C1, 1), lambda n: (0, 0)),
            pl.BlockSpec((1, Lp), lambda n: (0, 0)),
        ],
        out_specs=pl.BlockSpec((1, C1, Lp), lambda n: (n, 0, 0)),
        # "parallel" batch axis -> v7x shards over its 2 TensorCores; harmless
        # on single-TC v5e/v6e. Working set << scoped VMEM, no limit needed.
        compiler_params=pltpu.CompilerParams(dimension_semantics=("parallel",)),
    )(xp, w1p, b1p, w2p, b2p, border)

    # Slice the interior pixels back out (pad lanes are scratch) -> NCHW.
    out = out[:, :, :Hp * Wp].reshape(N, C1, Hp, Wp)[:, :, 1:H + 1, :W]
    return out


# ---------------------------------------------------------------------------
# Pure-JAX reference (matches PyTorch BasicBlock in eval mode, f32)
# ---------------------------------------------------------------------------
def basic_block_ref(x_nchw, params):
    (w1, g1, be1, m1, v1, w2, g2, be2, m2, v2) = params
    s1 = g1 / jnp.sqrt(v1 + BN_EPS)
    b1 = be1 - m1 * s1
    s2 = g2 / jnp.sqrt(v2 + BN_EPS)
    b2 = be2 - m2 * s2

    x = jnp.transpose(x_nchw, (0, 2, 3, 1)).astype(jnp.float32)  # NHWC
    dn = ("NHWC", "HWIO", "NHWC")
    w1_hwio = jnp.transpose(w1, (2, 3, 1, 0))
    w2_hwio = jnp.transpose(w2, (2, 3, 1, 0))

    y = lax.conv_general_dilated(x, w1_hwio, (1, 1), "VALID", dimension_numbers=dn)
    y = _leaky(y * s1[None, None, None, :] + b1[None, None, None, :])
    y = lax.conv_general_dilated(y, w2_hwio, (1, 1), ((1, 1), (1, 1)),
                                 dimension_numbers=dn)
    y = _leaky(y * s2[None, None, None, :] + b2[None, None, None, :])
    y = y + x
    return jnp.transpose(y, (0, 3, 1, 2))


if __name__ == "__main__":
    # BasicBlock(inplanes=4, planes=[2, 4]) on a (2, 4, 16, 16) input (NCHW).
    N, Cin, H, W = 2, 4, 16, 16
    planes = (2, 4)  # planes[1] must equal inplanes for the residual add
    C0, C1 = planes

    key = jax.random.PRNGKey(0)
    ks = jax.random.split(key, 9)

    x = jax.random.normal(ks[0], (N, Cin, H, W), jnp.float32)

    w1 = 0.3 * jax.random.normal(ks[1], (C0, Cin, 1, 1), jnp.float32)
    g1 = 0.5 + jax.random.uniform(ks[2], (C0,), jnp.float32)
    be1 = 0.1 * jax.random.normal(ks[3], (C0,), jnp.float32)
    m1 = 0.1 * jax.random.normal(ks[4], (C0,), jnp.float32)
    v1 = 0.5 + jax.random.uniform(ks[4], (C0,), jnp.float32)

    w2 = 0.3 * jax.random.normal(ks[5], (C1, C0, 3, 3), jnp.float32)
    g2 = 0.5 + jax.random.uniform(ks[6], (C1,), jnp.float32)
    be2 = 0.1 * jax.random.normal(ks[7], (C1,), jnp.float32)
    m2 = 0.1 * jax.random.normal(ks[8], (C1,), jnp.float32)
    v2 = 0.5 + jax.random.uniform(ks[8], (C1,), jnp.float32)

    params = (w1, g1, be1, m1, v1, w2, g2, be2, m2, v2)

    out = jax.block_until_ready(basic_block_forward(x, params))
    ref = jax.block_until_ready(basic_block_ref(x, params))

    assert out.shape == (N, Cin, H, W), out.shape
    # 2e-2 tolerance reflects bf16 MXU operands (f32 accumulation / elementwise).
    assert jnp.allclose(out, ref, atol=2e-2, rtol=2e-2), (
        float(jnp.max(jnp.abs(out - ref))))

    print("KERNEL_OK")
</pallas_src>

<mosaic_0001>
module attributes {stable_mosaic.version = 11 : i64} {
  func.func @kernel(%arg0: i32, %arg1: memref<1x4x384xf32, #tpu.memory_space<vmem>>, %arg2: memref<8x4xbf16, #tpu.memory_space<vmem>>, %arg3: memref<8x1xf32, #tpu.memory_space<vmem>>, %arg4: memref<4x72xbf16, #tpu.memory_space<vmem>>, %arg5: memref<4x1xf32, #tpu.memory_space<vmem>>, %arg6: memref<1x384xf32, #tpu.memory_space<vmem>>, %arg7: memref<1x4x384xf32, #tpu.memory_space<vmem>>) attributes {dimension_semantics = [#tpu.dimension_semantics<parallel>], iteration_bounds = array<i64: 2>, scalar_prefetch = 0 : i64, scratch_operands = 0 : i64, tpu.core_type = #tpu.core_type<tc>, window_params = [{transform_indices = @transform_0, window_bounds = array<i64: 1, 4, 384>}, {pipeline_mode = #tpu.pipeline_mode<synchronous>, transform_indices = @transform_1, window_bounds = array<i64: 8, 4>}, {pipeline_mode = #tpu.pipeline_mode<synchronous>, transform_indices = @transform_2, window_bounds = array<i64: 8, 1>}, {pipeline_mode = #tpu.pipeline_mode<synchronous>, transform_indices = @transform_3, window_bounds = array<i64: 4, 72>}, {pipeline_mode = #tpu.pipeline_mode<synchronous>, transform_indices = @transform_4, window_bounds = array<i64: 4, 1>}, {pipeline_mode = #tpu.pipeline_mode<synchronous>, transform_indices = @transform_5, window_bounds = array<i64: 1, 384>}, {transform_indices = @transform_6, window_bounds = array<i64: 1, 4, 384>}]} {
    %c0 = arith.constant 0 : index
    %c0_0 = arith.constant 0 : index
    %c0_1 = arith.constant 0 : index
    %0 = vector.load %arg1[%c0, %c0_0, %c0_1] : memref<1x4x384xf32, #tpu.memory_space<vmem>>, vector<1x4x384xf32>
    %1 = vector.shape_cast %0 : vector<1x4x384xf32> to vector<4x384xf32>
    %c0_2 = arith.constant 0 : index
    %c0_3 = arith.constant 0 : index
    %2 = vector.load %arg2[%c0_2, %c0_3] : memref<8x4xbf16, #tpu.memory_space<vmem>>, vector<8x4xbf16>
    %3 = arith.truncf %1 : vector<4x384xf32> to vector<4x384xbf16>
    %cst = arith.constant dense<0.000000e+00> : vector<8x384xf32>
    %4 = tpu.matmul %2, %3, %cst {dimension_numbers = #tpu.dot_dimension_numbers<[1], [0], [0], [1], [0, 0, 1, 1], [], []>} : vector<8x4xbf16>, vector<4x384xbf16>, vector<8x384xf32> -> vector<8x384xf32>
    %c0_4 = arith.constant 0 : index
    %c0_5 = arith.constant 0 : index
    %5 = vector.load %arg3[%c0_4, %c0_5] : memref<8x1xf32, #tpu.memory_space<vmem>>, vector<8x1xf32>
    %6 = vector.broadcast %5 : vector<8x1xf32> to vector<8x384xf32>
    %7 = arith.addf %4, %6 : vector<8x384xf32>
    %cst_6 = arith.constant 0.000000e+00 : f32
    %8 = vector.broadcast %cst_6 : f32 to vector<8x384xf32>
    %9 = arith.cmpf ogt, %7, %8 : vector<8x384xf32>
    %cst_7 = arith.constant 1.000000e-01 : f32
    %10 = vector.broadcast %cst_7 : f32 to vector<8x384xf32>
    %11 = arith.mulf %10, %7 : vector<8x384xf32>
    %12 = arith.select %9, %7, %11 : vector<8x384xi1>, vector<8x384xf32>
    %c0_8 = arith.constant 0 : index
    %c0_9 = arith.constant 0 : index
    %13 = vector.load %arg6[%c0_8, %c0_9] : memref<1x384xf32, #tpu.memory_space<vmem>>, vector<1x384xf32>
    %14 = vector.broadcast %13 : vector<1x384xf32> to vector<8x384xf32>
    %15 = arith.mulf %12, %14 : vector<8x384xf32>
    %c18_i32 = arith.constant 18 : i32
    %16 = tpu.dynamic_rotate %15 by %c18_i32 dim 1 : vector<8x384xf32>, i32 -> vector<8x384xf32>
    %c17_i32 = arith.constant 17 : i32
    %17 = tpu.dynamic_rotate %15 by %c17_i32 dim 1 : vector<8x384xf32>, i32 -> vector<8x384xf32>
    %c16_i32 = arith.constant 16 : i32
    %18 = tpu.dynamic_rotate %15 by %c16_i32 dim 1 : vector<8x384xf32>, i32 -> vector<8x384xf32>
    %c1_i32 = arith.constant 1 : i32
    %19 = tpu.dynamic_rotate %15 by %c1_i32 dim 1 : vector<8x384xf32>, i32 -> vector<8x384xf32>
    %c383_i32 = arith.constant 383 : i32
    %20 = tpu.dynamic_rotate %15 by %c383_i32 dim 1 : vector<8x384xf32>, i32 -> vector<8x384xf32>
    %c368_i32 = arith.constant 368 : i32
    %21 = tpu.dynamic_rotate %15 by %c368_i32 dim 1 : vector<8x384xf32>, i32 -> vector<8x384xf32>
    %c367_i32 = arith.constant 367 : i32
    %22 = tpu.dynamic_rotate %15 by %c367_i32 dim 1 : vector<8x384xf32>, i32 -> vector<8x384xf32>
    %c366_i32 = arith.constant 366 : i32
    %23 = tpu.dynamic_rotate %15 by %c366_i32 dim 1 : vector<8x384xf32>, i32 -> vector<8x384xf32>
    %24 = tpu.concatenate %16, %17, %18, %19, %15, %20, %21, %22, %23 in 0 : vector<8x384xf32>, vector<8x384xf32>, vector<8x384xf32>, vector<8x384xf32>, vector<8x384xf32>, vector<8x384xf32>, vector<8x384xf32>, vector<8x384xf32>, vector<8x384xf32> -> vector<72x384xf32>
    %25 = arith.truncf %24 : vector<72x384xf32> to vector<72x384xbf16>
    %c0_10 = arith.constant 0 : index
    %c0_11 = arith.constant 0 : index
    %26 = vector.load %arg4[%c0_10, %c0_11] : memref<4x72xbf16, #tpu.memory_space<vmem>>, vector<4x72xbf16>
    %cst_12 = arith.constant dense<0.000000e+00> : vector<4x384xf32>
    %27 = tpu.matmul %26, %25, %cst_12 {dimension_numbers = #tpu.dot_dimension_numbers<[1], [0], [0], [1], [0, 0, 1, 1], [], []>} : vector<4x72xbf16>, vector<72x384xbf16>, vector<4x384xf32> -> vector<4x384xf32>
    %c0_13 = arith.constant 0 : index
    %c0_14 = arith.constant 0 : index
    %28 = vector.load %arg5[%c0_13, %c0_14] : memref<4x1xf32, #tpu.memory_space<vmem>>, vector<4x1xf32>
    %29 = vector.broadcast %28 : vector<4x1xf32> to vector<4x384xf32>
    %30 = arith.addf %27, %29 : vector<4x384xf32>
    %cst_15 = arith.constant 0.000000e+00 : f32
    %31 = vector.broadcast %cst_15 : f32 to vector<4x384xf32>
    %32 = arith.cmpf ogt, %30, %31 : vector<4x384xf32>
    %cst_16 = arith.constant 1.000000e-01 : f32
    %33 = vector.broadcast %cst_16 : f32 to vector<4x384xf32>
    %34 = arith.mulf %33, %30 : vector<4x384xf32>
    %35 = arith.select %32, %30, %34 : vector<4x384xi1>, vector<4x384xf32>
    %36 = arith.addf %35, %1 : vector<4x384xf32>
    %c0_17 = arith.constant 0 : index
    %c0_18 = arith.constant 0 : index
    %c0_19 = arith.constant 0 : index
    %37 = vector.load %arg7[%c0_17, %c0_18, %c0_19] : memref<1x4x384xf32, #tpu.memory_space<vmem>>, vector<1x4x384xf32>
    %38 = vector.shape_cast %37 : vector<1x4x384xf32> to vector<4x384xf32>
    %39 = vector.shape_cast %36 : vector<4x384xf32> to vector<1x4x384xf32>
    tpu.vector_store %arg7[%c0_17, %c0_18, %c0_19], %39 {strides = array<i32>} : memref<1x4x384xf32, #tpu.memory_space<vmem>>, vector<1x4x384xf32>,
    return
  }
  func.func @transform_0(%arg0: i32) -> (i32, i32, i32) {
    %c0_i32 = arith.constant 0 : i32
    %c0_i32_0 = arith.constant 0 : i32
    %c0_i32_1 = arith.constant 0 : i32
    return %arg0, %c0_i32, %c0_i32_0 : i32, i32, i32
  }
  func.func @transform_1(%arg0: i32) -> (i32, i32) {
    %c0_i32 = arith.constant 0 : i32
    %c0_i32_0 = arith.constant 0 : i32
    %c0_i32_1 = arith.constant 0 : i32
    return %c0_i32, %c0_i32_0 : i32, i32
  }
  func.func @transform_2(%arg0: i32) -> (i32, i32) {
    %c0_i32 = arith.constant 0 : i32
    %c0_i32_0 = arith.constant 0 : i32
    %c0_i32_1 = arith.constant 0 : i32
    return %c0_i32, %c0_i32_0 : i32, i32
  }
  func.func @transform_3(%arg0: i32) -> (i32, i32) {
    %c0_i32 = arith.constant 0 : i32
    %c0_i32_0 = arith.constant 0 : i32
    %c0_i32_1 = arith.constant 0 : i32
    return %c0_i32, %c0_i32_0 : i32, i32
  }
  func.func @transform_4(%arg0: i32) -> (i32, i32) {
    %c0_i32 = arith.constant 0 : i32
    %c0_i32_0 = arith.constant 0 : i32
    %c0_i32_1 = arith.constant 0 : i32
    return %c0_i32, %c0_i32_0 : i32, i32
  }
  func.func @transform_5(%arg0: i32) -> (i32, i32) {
    %c0_i32 = arith.constant 0 : i32
    %c0_i32_0 = arith.constant 0 : i32
    %c0_i32_1 = arith.constant 0 : i32
    return %c0_i32, %c0_i32_0 : i32, i32
  }
  func.func @transform_6(%arg0: i32) -> (i32, i32, i32) {
    %c0_i32 = arith.constant 0 : i32
    %c0_i32_0 = arith.constant 0 : i32
    %c0_i32_1 = arith.constant 0 : i32
    return %arg0, %c0_i32, %c0_i32_0 : i32, i32, i32
  }
}

</mosaic_0001>

<bundles_post_ra>
// kernel: tpu_custom_call.1
= control target key start
LH: loop header
LB: loop body
LE: loop exit
PB: predicated region body
PF: predicated region fallthrough
CT: control target
= control target key end

     0   :  { %11 = vsyncpa [#allocation3], 0  ;;  %s1255_s0 = inlined_call_operand.hbm [shape: f32[2,4,384], index: 0, kind: input, shape index: {}]   ;;  %s1256_s1 = inlined_call_operand.vmem [shape: bf16[8,4], index: 1, kind: input, shape index: {}]   ;;  %s1257_s2 = inlined_call_operand.vmem [shape: f32[8,1], index: 2, kind: input, shape index: {}]   ;;  %s1258_s3 = inlined_call_operand.vmem [shape: bf16[4,72], index: 3, kind: input, shape index: {}]   ;;  %s1259_s4 = inlined_call_operand.vmem [shape: f32[4,1], index: 4, kind: input, shape index: {}]   ;;  %s1260_s5 = inlined_call_operand.vmem [shape: f32[1,384], index: 5, kind: input, shape index: {}]   ;;  %s1261_s6 = inlined_call_operand.hbm [shape: f32[2,4,384], index: 6, kind: output, shape index: {}]  }
   0x1   :  { %13 = vsyncpa [#allocation3 + $0x1], 0 }
   0x2   :  { %14 = vsyncpa [#allocation4], 0 }
   0x3   :  { %16 = vsyncpa [#allocation4 + $0x1], 0  ;;  %s998_s21 = smov 0   ;;  %s1000_s22 = smov 0  }
   0x4   :  { %s1002_s23 = smov 0   ;;  %s1004_s24 = smov 0  }
   0x5 LB: > { %s1019_s25 = sadd.s32 4294967295, %s948_s24   ;;  %s710_s26 = sadd.s32 4294967294, %s948_s24   ;;  %s948_s24 = sphi %s1004_s24, %s1277_s24   ;;  %s944_s23 = sphi %s1002_s23, %s1276_s23   ;;  %s940_s22 = sphi %s1000_s22, %s1275_s22   ;;  %s936_s21 = sphi %s998_s21, %s1274_s21  }
   0x6   : > { %s1023_s27 = sadd.s32 1, %s948_s24   ;;  %s29_s28 = sadd.s32 1, %s944_s23 }
   0x7   : > { %s26_s29 = ssub.s32 %s948_s24, %s1023_s27  ;;  %p36_p0 = scmp.ne.s32.totalorder %s944_s23, %s940_s22 }
   0x8   : > { %p27_p1 = scmp.eq.s32.totalorder %s26_s29, 0  ;;  %p37_p2 = scmp.eq.s32.totalorder %s948_s24, 0 }
   0x9   : > { %p42_p3 = scmp.ne.s32.totalorder %s940_s22, %s936_s21  ;;  %p43_p4 = scmp.eq.s32.totalorder %s1019_s25, 0 }
   0xa   : > { %s1035_s30 = scalar_select %p27_p1, %s944_s23, %s29_s28  }
   0xb   : > { %p38_p5 = por %p37_p2, %p36_p0  ;;  %p1037_p6 = por %p43_p4, %p42_p3 }
   0xc   : > { %p171_p7 = scmp.eq.s32.totalorder %s1019_s25, 1  ;;  %p177_p8 = scmp.eq.s32.totalorder %s710_s26, 1 }
   0xd   : > { %s1264_s7 = scalar_select %p1037_p6, 1, 0 }
   0xe   : > { %p768_p10 = scmp.lt.s32.totalorder %s948_s24, 2  ;;  %p1044_p11 = por %p171_p7, %p36_p0 }
   0xf   : > { %p1048_p12 = por %p177_p8, %p42_p3  ;;  %s212_s10 = sand.u32 1, %s944_s23  }
  0x10   : > { %s1265_s8 = scalar_select %p1044_p11, 1, 0 }
  0x11   : > { %s1266_s9 = scalar_select %p1048_p12, 1, 0 }
  0x12   : > { %s753_s11 = smul.u32 192, %s948_s24  ;;  %p1059_p13 = pnand %p768_p10, %p38_p5 }
  0x13   : > { %s752_s12 = smul.u32 12, %s212_s10  ;;  %s213_s19 = scalar_lea.sflag [#allocation3], %s212_s10 }
  0x14   : > { %s1057_s15 = scalar_lea.hbm %s1255_s0, %s753_s11  ;;  %p858_p3 = pneg %p1059_p13 }
  0x15   : > { %s216_s17 = scalar_lea.vmem [#allocation2], %s752_s12  ;;  %s856_s20 = scalar_lea.hbm %s1057_s15, 192 }
  0x16   : > { %s224_s18 = sshll.u32 %s216_s17, 4  ;;  %p857_p2 = scmp.ne.s32.totalorder %s1057_s15, %s856_s20  ;;  %s225_s18 = int_to_ptr.vmem [resolvable:$true] %s224_s18 }
  0x17   : > { %s861_s29 = scalar_lea.hbm %s1255_s0, 384  ;;  %p862_p5 = scmp.lt.s32.totalorder %s1057_s15, %s1255_s0 }
  0x18   : > { %p859_p4 = pnand %p858_p3, %p857_p2  ;;  %p863_p8 = scmp.lt.s32.totalorder %s861_s29, %s856_s20 }
  0x1a   : > { %p860_p7 = pneg %p859_p4  ;;  %p864_p10 = por %p863_p8, %p862_p5 }
  0x1c   : > { %p865_p9 = pnand %p864_p10, %p860_p7 }
  0x1e   : > { %868 = shalt.err (!%p865_p9)
}
  0x1f   : > { %s869_s12 = scalar_lea.vmem %s225_s18, 192  ;;  %s950_s10 = smov [#allocation2]  }
  0x20   : > { %p870_p0 = scmp.ne.s32.totalorder %s225_s18, %s869_s12  ;;  %s874_s14 = sshll.u32 %s950_s10, 4  ;;  %s875_s14 = int_to_ptr.vmem [resolvable:$false] %s874_s14 }
  0x21   : > { %s876_s17 = scalar_lea.vmem %s875_s14, 384  ;;  %p877_p2 = scmp.lt.s32.totalorder %s225_s18, %s875_s14 }
  0x22   : > { %p872_p1 = pnand %p870_p0, %p858_p3  ;;  %p878_p4 = scmp.lt.s32.totalorder %s876_s17, %s869_s12 }
  0x24   : > { %p873_p12 = pneg %p872_p1  ;;  %p879_p11 = por %p878_p4, %p877_p2 }
  0x26   : > { %p880_p6 = pnand %p879_p11, %p873_p12 }
  0x28   : > { %883 = shalt.err (!%p880_p6)
}
  0x29   : > { %763 = dma.hbm_to_vmem [thread:$0]  (!%p1059_p13), %s1057_s15, 192, %s225_s18, %s213_s19  }
  0x2a   : > { %p1268_p9 = scmp.lt.s32.totalorder %s948_s24, 3  ;;  %p1269_p7 = scmp.ge.s32.totalorder %s948_s24, 1 }
  0x2c   : > { %p230_p5 = pnand %p1269_p7, %p1268_p9 }
  0x2d   : > { %s1084_s20 = sand.u32 (!%p230_p5), 1, %s940_s22   ;;  %p1270_p6 = scmp.ne.s32.totalorder (!%p230_p5), %s1264_s7, 0 }
  0x2e   : > { %233 = sbr.rel (%p230_p5) target bundleno = 628 (0x274), region = 44  ;;  %s236_s28 = scalar_lea.sflag (!%p230_p5), [#allocation3], %s1084_s20 }
  0x2f   : > { %s754_s26 = smul.u32 (!%p230_p5), 12, %s1084_s20 }
  0x31   : > { %s239_s29 = scalar_lea.vmem (!%p230_p5), [#allocation2], %s754_s26 }
  0x33   : > { %927 = dma.done.wait (%p1270_p6), %s236_s28, 192  }
  0x34   : > { %929 = vsyncadd (%p1270_p6), %s236_s28, 4294967104  ;;  %v951_v0 = vmov 0.0   ;;  %vm952_vm0 = vmmov 0   ;;  %v953_v1 = vmov 0   ;;  %v1097_v2 = vld [vmem:[%s239_s29 + $0x8] sm:$0xf]  ;;  %v390_v12 = vlaneseq }
  0x35   : > { %732 = vmatprep.subr.bf16.mxu1 %v951_v0  ;;  %734 = vmatprep.mubr.msk.bf16.mxu1 %vm952_vm0, %v951_v0  ;;  %vm288_vm1 = vcmask 1041408   ;;  %v1099_v3 = vld [vmem:[%s239_s29] sm:$0xff]  ;;  %v277_v4 = vpack.c.bf16 %v1097_v2, %v1097_v2  ;;  %vm284_vm2 = vcmask 31744   ;;  %s954_s13 = smov 110   ;;  %s955_s12 = smov 111   ;;  %vm516_vm8 = vcmask 1043456  }
  0x36   : > { %330 = vmatprep.mubr.bf16.mxu0 %v953_v1  ;;  %813 = vset.pattern.permute.xlu0 %v953_v1  ;;  %v1105_v5 = vcombine.high %v1099_v3, %v1099_v3  ;;  %v275_v6 = vpack.c.bf16 %v1099_v3, %v1099_v3  ;;  %v278_v7 = vld [vmem:[%s1257_s2] sm:$0xff]  ;;  %v391_v13 = vshrl.u32 %v390_v12, 7  ;;  %s956_s10 = smov 16   ;;  %s957_s14 = smov 127   ;;  %v1148_v48 = vand.u32 127, %v390_v12 }
  0x37   : > { %854 = vset.pattern.permute.xlu1 %v953_v1  ;;  %281 = vperm.xlu0 %813, %v278_v7   ;;  %v296_v8 = vsel %vm288_vm1, %v277_v4, 0  ;;  %v271_v11 = vld [vmem:[%s1256_s1] sm:$0xf]  ;;  %s958_s17 = smov 112   ;;  %s959_s28 = smov 1   ;;  %vm512_vm15 = vcmask 588800  }
  0x38   : > { %v276_v9 = vpack.c.bf16 %v1105_v5, %v1105_v5  ;;  %v290_v10 = vsel %vm288_vm1, %v275_v6, 0  ;;  %733 = vmatpush3.bf16.msra.mxu1 %v296_v8  ;;  %v400_v15 = vsub.s32 2, %v391_v13  ;;  %v388_v16 = vld [vmem:[%s1260_s5] sm:$0x7]  ;;  %v392_v18 = vsub.s32 0, %v391_v13  ;;  %s960_s29 = smov 18  }
  0x39   : > { %738 = vmatprep.subr.bf16.mxu1 %v951_v0  ;;  %v396_v27 = vsub.s32 1, %v391_v13  ;;  %s961_s7 = smov 17   ;;  %v506_v44 = vld [vmem:[%s1259_s4] sm:$0xf]  ;;  %vm486_vm6 = vcmp.lt.s32.totalorder %v1148_v48, 110  ;;  %vm466_vm7 = vcmp.lt.s32.totalorder %v1148_v48, 112 }
  0x3a   : > { %715 = vmatprep.subr.msk.bf16.mxu0 %vm288_vm1, %v276_v9  ;;  %v401_v20 = vrot.slane %v388_v16, %v400_v15  ;;  %v393_v25 = vrot.slane %v388_v16, %v392_v18  ;;  %vm476_vm9 = vcmp.lt.s32.totalorder %v1148_v48, 111  ;;  %vm456_vm10 = vcmp.lt.s32.totalorder %v1148_v48, 127  ;;  %s755_s11 = smul.u32 192, %s1019_s25  ;;  %s626_s25 = scalar_lea.sflag [#allocation4], %s1084_s20 }
  0x3b   : > { %313 = vmatpush1.bf16.msra.mxu0 %v290_v10  ;;  %735 = vmatmul.mubr.msk.bf16.vlgmr.msra.gmra.mxu1 %vm284_vm2, %v271_v11  ;;  %v397_v38 = vrot.slane %v388_v16, %v396_v27  ;;  %vm436_vm11 = vcmp.lt.s32.totalorder %v1148_v48, 16  ;;  %vm446_vm12 = vcmp.lt.s32.totalorder %v1148_v48, 1  ;;  %vm416_vm13 = vcmp.lt.s32.totalorder %v1148_v48, 18  ;;  %p1271_p12 = scmp.ne.s32.totalorder %s1265_s8, 0 }
  0x3c   : > { %748 = vmatprep.mubr.msk.bf16.mxu1 %vm952_vm0, %v951_v0  ;;  %vm426_vm14 = vcmp.lt.s32.totalorder %v1148_v48, 17 }
  0x3e   : > { %716 = vmatmul.mubr.msk.bf16.vlgmr.msra.gmra.mxu0 %vm284_vm2, %v271_v11 }
  0x3f   : > { %558 = vmatprep.mubr.bf16.mxu0 %v953_v1 }
  0xb2   : > { %v282_v14 = vpop.permute.xlu0 %281 }
  0xfb   : > { %v373_v17 = vpop.f32.mrf.mxu1 }
  0xfc   : > { %v374_v19 = vadd.f32 %v373_v17, %v282_v14 }
  0xfd   : > { %v736_v22 = vpop.f32.mrf.mxu1 }
  0xfe   : > { %v332_v21 = vpop.f32.mrf.mxu0  ;;  %vm381_vm3 = vcmp.gt.f32.partialorder %v374_v19, 0.0  ;;  %v384_v23 = vmul.f32 0.1, %v374_v19 }
  0xff   : > { %v333_v24 = vadd.f32 %v332_v21, %v282_v14  ;;  %v376_v28 = vpop.f32.mrf.mxu1 }
 0x100   : > { %v334_v26 = vpop.f32.mrf.mxu0  ;;  %v387_v29 = vsel %vm381_vm3, %v374_v19, %v384_v23 }
 0x101   : > { %vm379_vm4 = vcmp.gt.f32.partialorder %v333_v24, 0.0  ;;  %v382_v30 = vmul.f32 0.1, %v333_v24  ;;  %v335_v31 = vadd.f32 %v334_v26, %v282_v14  ;;  %v1124_v32 = vmul.f32 %v401_v20, %v387_v29  ;;  %v737_v34 = vpop.f32.mrf.mxu1 }
 0x102   : > { %v336_v33 = vpop.f32.mrf.mxu0 }
 0x103   : > { %v385_v35 = vsel %vm379_vm4, %v333_v24, %v382_v30  ;;  %vm380_vm5 = vcmp.gt.f32.partialorder %v335_v31, 0.0  ;;  %v383_v36 = vmul.f32 0.1, %v335_v31  ;;  %484 = vrot.lane.b32.xlu1 %v1124_v32, %s954_s13 }
 0x104   : > { %v1126_v37 = vmul.f32 %v393_v25, %v385_v35  ;;  %v337_v39 = vpop.f32.mrf.mxu0 }
 0x105   : > { %v386_v40 = vsel %vm380_vm5, %v335_v31, %v383_v36 }
 0x106   : > { %470 = vrot.lane.b32.xlu0 %v1126_v37, %s955_s12  ;;  %v1130_v41 = vmul.f32 %v397_v38, %v386_v40 }
 0x107   : > { %434 = vrot.lane.b32.xlu1 %v1124_v32, %s956_s10 }
 0x108   : > { %v814_v42 = vpack.i.bf16 %v1130_v41, %v1126_v37  ;;  %v819_v43 = vpack.i.bf16 %v1124_v32, %v1130_v41 }
 0x10a   : > { %450 = vrot.lane.b32.xlu0 %v1126_v37, %s957_s14 }
 0x10b   : > { %460 = vrot.lane.b32.xlu1 %v1126_v37, %s958_s17 }
 0x10e   : > { %815 = vrot.lane.b32.xlu0 %v814_v42, %s954_s13  ;;  %s267_s13 = scalar_lea.vmem [#allocation5], %s754_s26  ;;  %s962_s26 = smov [#allocation5]  }
 0x10f   : > { %820 = vrot.lane.b32.xlu1 %v819_v43, %s958_s17  ;;  %s638_s17 = scalar_lea.hbm %s1261_s6, %s755_s11 }
 0x112   : > { %825 = vrot.lane.b32.xlu0 %v819_v43, %s955_s12  ;;  %s640_s12 = sshll.u32 %s267_s13, 4  ;;  %s641_s12 = int_to_ptr.vmem [resolvable:$true] %s640_s12 }
 0x113   : > { %830 = vrot.lane.b32.xlu1 %v819_v43, %s957_s14 }
 0x116   : > { %444 = vrot.lane.b32.xlu0 %v1124_v32, %s959_s28 }
 0x117   : > { %835 = vrot.lane.b32.xlu1 %v814_v42, %s956_s10 }
 0x11a   : > { %840 = vrot.lane.b32.xlu0 %v814_v42, %s959_s28  ;;  %s884_s28 = scalar_lea.vmem %s641_s12, 192 }
 0x11b   : > { %845 = vrot.lane.b32.xlu1 %v814_v42, %s960_s29  ;;  %p885_p11 = scmp.ne.s32.totalorder %s641_s12, %s884_s28 }
 0x11d   : > { %p886_p13 = pnand %p885_p11, %p1271_p12 }
 0x11e   : > { %850 = vrot.lane.b32.xlu0 %v814_v42, %s961_s7 }
 0x11f   : > { %412 = vrot.lane.b32.xlu1 %v1124_v32, %s960_s29  ;;  %p887_p0 = pneg %p886_p13  ;;  %s888_s29 = sshll.u32 %s962_s26, 4  ;;  %s889_s29 = int_to_ptr.vmem [resolvable:$false] %s888_s29 }
 0x120   : > { %p891_p1 = scmp.lt.s32.totalorder %s641_s12, %s889_s29 }
 0x122   : > { %424 = vrot.lane.b32.xlu0 %v1124_v32, %s961_s7  ;;  %s890_s7 = scalar_lea.vmem %s889_s29, 384 }
 0x123   : > { %509 = vperm.xlu1 %854, %v506_v44   ;;  %p892_p3 = scmp.lt.s32.totalorder %s890_s7, %s884_s28 }
 0x125   : > { %p893_p8 = por %p892_p3, %p891_p1 }
 0x127   : > { %p894_p10 = pnand %p893_p8, %p887_p0 }
 0x175   : > { %v485_v45 = vpop.permute.xlu1 %484 }
 0x178   : > { %v471_v46 = vpop.permute.xlu0 %470 }
 0x179   : > { %v1145_v47 = vpop.permute.xlu1 %434 }
 0x17c   : > { %v451_v49 = vpop.permute.xlu0 %450 }
 0x17d   : > { %v461_v50 = vpop.permute.xlu1 %460 }
 0x180   : > { %v816_v51 = vpop.permute.xlu0 %815 }
 0x181   : > { %v818_v52 = vunpack.i.h.bf16 %v816_v51  ;;  %v817_v53 = vunpack.i.l.bf16 %v816_v51  ;;  %v821_v54 = vpop.permute.xlu1 %820 }
 0x182   : > { %v823_v56 = vunpack.i.h.bf16 %v821_v54  ;;  %v822_v57 = vunpack.i.l.bf16 %v821_v54 }
 0x183   : > { %v487_v55 = vsel %vm486_vm6, %v818_v52, %v485_v45  ;;  %v488_v58 = vsel %vm486_vm6, %v817_v53, %v818_v52  ;;  %v489_v62 = vsel %vm486_vm6, %v485_v45, %v817_v53 }
 0x184   : > { %v503_v59 = vpack.c.bf16 %v487_v55, %v487_v55  ;;  %v826_v60 = vpop.permute.xlu0 %825  ;;  %v502_v61 = vpack.c.bf16 %v488_v58, %v488_v58  ;;  %v469_v4 = vsel %vm466_vm7, %v823_v56, %v461_v50  ;;  %v468_v6 = vsel %vm466_vm7, %v461_v50, %v822_v57 }
 0x185   : > { %v828_v63 = vunpack.i.h.bf16 %v826_v60  ;;  %v827_v1 = vunpack.i.l.bf16 %v826_v60  ;;  %v831_v7 = vpop.permute.xlu1 %830  ;;  %v504_v9 = vpack.c.bf16 %v489_v62, %v489_v62  ;;  %v467_v17 = vsel %vm466_vm7, %v822_v57, %v823_v56  ;;  %v505_v60 = vld [vmem:[%s1258_s3] sm:$0x3] }
 0x186   : > { %718 = vmatprep.subr.msk.bf16.mxu0 %vm516_vm8, %v503_v59  ;;  %v518_v8 = vsel %vm516_vm8, %v502_v61, 0  ;;  %v833_v12 = vunpack.i.h.bf16 %v831_v7  ;;  %v832_v13 = vunpack.i.l.bf16 %v831_v7 }
 0x187   : > { %v479_v10 = vsel %vm476_vm9, %v828_v63, %v471_v46  ;;  %v478_v11 = vsel %vm476_vm9, %v471_v46, %v827_v1  ;;  %533 = vmatpush1.bf16.msra.mxu0 %v518_v8  ;;  %v524_v15 = vsel %vm516_vm8, %v504_v9, 0  ;;  %v477_v18 = vsel %vm476_vm9, %v827_v1, %v828_v63 }
 0x188   : > { %v499_v14 = vpack.c.bf16 %v478_v11, %v468_v6  ;;  %v445_v16 = vpop.permute.xlu0 %444  ;;  %v501_v19 = vpack.c.bf16 %v479_v10, %v469_v4  ;;  %739 = vmatpush3.bf16.msra.mxu1 %v524_v15  ;;  %v500_v20 = vpack.c.bf16 %v477_v18, %v467_v17  ;;  %v457_v21 = vsel %vm456_vm10, %v832_v13, %v833_v12 }
 0x189   : > { %740 = vmatprep.subr.bf16.mxu1 %v951_v0  ;;  %v836_v22 = vpop.permute.xlu1 %835  ;;  %v497_v23 = vpack.c.bf16 %v457_v21, %v1130_v41  ;;  %v459_v24 = vsel %vm456_vm10, %v833_v12, %v451_v49  ;;  %v458_v25 = vsel %vm456_vm10, %v451_v49, %v832_v13 }
 0x18a   : > { %v837_v26 = vunpack.i.l.bf16 %v836_v22  ;;  %534 = vmatprep.subr.bf16.mxu0 %v500_v20  ;;  %v838_v27 = vunpack.i.h.bf16 %v836_v22  ;;  %v498_v31 = vpack.c.bf16 %v459_v24, %v1124_v32  ;;  %v496_v33 = vpack.c.bf16 %v458_v25, %v1126_v37 }
 0x18b   : > { %535 = vmatpush1.bf16.msra.mxu0 %v499_v14 }
 0x18c   : > { %v841_v28 = vpop.permute.xlu0 %840  ;;  %741 = vmatpush3.bf16.msra.mxu1 %v501_v19  ;;  %536 = vmatprep.subr.bf16.mxu0 %v497_v23  ;;  %v439_v34 = vsel %vm436_vm11, %v1145_v47, %v837_v26  ;;  %v437_v32 = vsel %vm436_vm11, %v838_v27, %v1145_v47  ;;  %v438_v42 = vsel %vm436_vm11, %v837_v26, %v838_v27 }
 0x18d   : > { %v843_v29 = vunpack.i.h.bf16 %v841_v28  ;;  %v842_v30 = vunpack.i.l.bf16 %v841_v28  ;;  %v846_v35 = vpop.permute.xlu1 %845  ;;  %742 = vmatprep.subr.bf16.mxu1 %v951_v0 }
 0x18e   : > { %v848_v39 = vunpack.i.h.bf16 %v846_v35  ;;  %v847_v40 = vunpack.i.l.bf16 %v846_v35 }
 0x18f   : > { %v447_v36 = vsel %vm446_vm12, %v843_v29, %v445_v16  ;;  %v449_v38 = vsel %vm446_vm12, %v445_v16, %v842_v30  ;;  %537 = vmatpush1.bf16.msra.mxu0 %v496_v33  ;;  %v448_v43 = vsel %vm446_vm12, %v842_v30, %v843_v29 }
 0x190   : > { %v493_v37 = vpack.c.bf16 %v449_v38, %v439_v34  ;;  %v851_v41 = vpop.permute.xlu0 %850  ;;  %v495_v44 = vpack.c.bf16 %v447_v36, %v437_v32  ;;  %743 = vmatpush3.bf16.msra.mxu1 %v498_v31  ;;  %v494_v49 = vpack.c.bf16 %v448_v43, %v438_v42  ;;  %v418_v47 = vsel %vm416_vm13, %v847_v40, %v848_v39 }
 0x191   : > { %v853_v45 = vunpack.i.h.bf16 %v851_v41  ;;  %v852_v46 = vunpack.i.l.bf16 %v851_v41  ;;  %v413_v50 = vpop.permute.xlu1 %412  ;;  %744 = vmatprep.subr.bf16.mxu1 %v951_v0 }
 0x192   : > { %538 = vmatprep.subr.bf16.mxu0 %v494_v49  ;;  %v417_v54 = vsel %vm416_vm13, %v848_v39, %v413_v50  ;;  %v419_v55 = vsel %vm416_vm13, %v413_v50, %v847_v40 }
 0x193   : > { %v428_v51 = vsel %vm426_vm14, %v852_v46, %v853_v45  ;;  %539 = vmatpush1.bf16.msra.mxu0 %v493_v37 }
 0x194   : > { %v425_v52 = vpop.permute.xlu0 %424  ;;  %v491_v53 = vpack.c.bf16 %v428_v51, %v418_v47  ;;  %745 = vmatpush3.bf16.msra.mxu1 %v495_v44 }
 0x195   : > { %v427_v56 = vsel %vm426_vm14, %v853_v45, %v425_v52  ;;  %v429_v57 = vsel %vm426_vm14, %v425_v52, %v852_v46  ;;  %746 = vmatprep.subr.bf16.mxu1 %v951_v0 }
 0x196   : > { %v490_v58 = vpack.c.bf16 %v429_v57, %v419_v55  ;;  %v492_v59 = vpack.c.bf16 %v427_v56, %v417_v54  ;;  %540 = vmatprep.subr.bf16.mxu0 %v491_v53 }
 0x198   : > { %541 = vmatpush1.bf16.msra.mxu0 %v490_v58  ;;  %747 = vmatpush3.bf16.msra.mxu1 %v492_v59 }
 0x19b   : > { %719 = vmatmul.mubr.msk.bf16.vlgmr.msra.gmra.mxu0 %vm512_vm15, %v505_v60  ;;  %749 = vmatmul.mubr.msk.bf16.vlgmr.msra.gmra.mxu1 %vm512_vm15, %v505_v60 }
 0x19e   : > { %v510_v61 = vpop.permute.xlu1 %509 }
 0x25b   : > { %v560_v62 = vpop.f32.mrf.mxu0  ;;  %v601_v1 = vpop.f32.mrf.mxu1 }
 0x25c   : > { %v561_v63 = vadd.f32 %v560_v62, %v510_v61  ;;  %v602_v48 = vadd.f32 %v601_v1, %v510_v61 }
 0x25d   : > { %v562_v4 = vpop.f32.mrf.mxu0  ;;  %v750_v7 = vpop.f32.mrf.mxu1 }
 0x25e   : > { %vm607_vm0 = vcmp.gt.f32.partialorder %v561_v63, 0.0  ;;  %v610_v6 = vmul.f32 0.1, %v561_v63  ;;  %v563_v0 = vadd.f32 %v562_v4, %v510_v61  ;;  %vm609_vm1 = vcmp.gt.f32.partialorder %v602_v48, 0.0 }
 0x25f   : > { %v612_v8 = vmul.f32 0.1, %v602_v48  ;;  %v564_v9 = vpop.f32.mrf.mxu0  ;;  %v604_v12 = vpop.f32.mrf.mxu1 }
 0x260   : > { %v613_v10 = vsel %vm607_vm0, %v561_v63, %v610_v6  ;;  %vm608_vm2 = vcmp.gt.f32.partialorder %v563_v0, 0.0  ;;  %v611_v11 = vmul.f32 0.1, %v563_v0 }
 0x261   : > { %v615_v13 = vsel %vm609_vm1, %v602_v48, %v612_v8  ;;  %v565_v14 = vpop.f32.mrf.mxu0  ;;  %v751_v17 = vpop.f32.mrf.mxu1  ;;  %v616_v18 = vadd.f32 %v613_v10, %v1099_v3 }
 0x262   : > { %v618_v15 = vadd.f32 %v615_v13, %v1097_v2  ;;  %v614_v16 = vsel %vm608_vm2, %v563_v0, %v611_v11 }
 0x263   : > { %v617_v19 = vadd.f32 %v614_v16, %v1105_v5 }
 0x264   : > { %624 = vst [vmem:[%s267_s13 + $0x8] sm:$0xf] %v618_v15 }
 0x265   : > { %v621_v20 = vcombine.low %v616_v18, %v617_v19 }
 0x267   : > { %623 = vst [vmem:[%s267_s13] sm:$0xff] %v621_v20 }
 0x268   : > { %897 = shalt.err (!%p894_p10)
}
 0x269   : > { %s898_s15 = scalar_lea.hbm %s638_s17, 192  ;;  %s902_s18 = scalar_lea.hbm %s1261_s6, 384 }
 0x26a   : > { %p899_p2 = scmp.ne.s32.totalorder %s638_s17, %s898_s15  ;;  %p903_p7 = scmp.lt.s32.totalorder %s638_s17, %s1261_s6 }
 0x26b   : > { %p904_p5 = scmp.lt.s32.totalorder %s902_s18, %s898_s15 }
 0x26c   : > { %p900_p4 = pnand %p899_p2, %p1271_p12 }
 0x26d   : > { %p905_p6 = por %p904_p5, %p903_p7 }
 0x26e   : > { %p901_p9 = pneg %p900_p4 }
 0x270   : > { %p906_p11 = pnand %p905_p6, %p901_p9 }
 0x272   : > { %909 = shalt.err (!%p906_p11)
}
 0x273   : > { %758 = dma.vmem_to_hbm [thread:$0]  (%p1271_p12), %s641_s12, 192, %s638_s17, %s626_s25  }
 0x274 PF: > { %s652_s13 = sand.u32 1, %s936_s21   ;;  %p1272_p13 = scmp.ne.s32.totalorder %s1266_s9, 0 }
 0x275   : > { %p1273_p0 = scmp.ge.s32.totalorder %s948_s24, 2  ;;  %s653_s10 = scalar_lea.sflag [#allocation4], %s652_s13 }
 0x277   : > { %p765_p1 = pnand %p1273_p0, %p1272_p13 }
 0x279   : > { %p766_p3 = pneg %p765_p1 }
 0x27b   : > { %931 = dma.done.wait (%p766_p3), %s653_s10, 192  }
 0x27c   : > { %933 = vsyncadd (%p766_p3), %s653_s10, 4294967104  ;;  %p19_p8 = scmp.ge.s32.totalorder %s1023_s27, 4   ;;  %s1274_s21 = smov %s940_s22 }
 0x27d   : > { %s1275_s22 = smov %s944_s23  ;;  %s1276_s23 = smov %s1035_s30 }
 0x27e   : > { %s1277_s24 = smov %s1023_s27  ;;  %21 = sbr.rel (!%p19_p8) target bundleno = 5 (0x5), region = 89 }
 0x283   :  { %658 = vsyncpa [#allocation3], 1 }
 0x284   :  { %660 = vsyncpa [#allocation3 + $0x1], 1 }
 0x285   :  { %661 = vsyncpa [#allocation4], 1 }
 0x286   :  { %663 = vsyncpa [#allocation4 + $0x1], 1 }

</bundles_post_ra>
